<compile_context>
chip_gen: v7x
topology: tpu7x:2x2x1
jax: 0.10.0
libtpu: 0.0.40
codegen_flags: <defaults>
</compile_context>

<pallas_src>
import functools

import jax
import jax.numpy as jnp
from jax.experimental import pallas as pl
from jax.experimental.pallas import tpu as pltpu


BS = 8  # batch-shard size (= f32 sublane count); slab bias rows are pre-broadcast to BS rows.


# --------------------------------------------------------------------------------- kernels
def embed_kernel(x_ref, w_emb_ref, wb_ref, out_ref, *, H):
    """pre_e = relu(x @ W_emb + b_emb) @ W_pre_emb + b_pre for one tile of (t, b) rows."""
    emb = jnp.dot(x_ref[...], w_emb_ref[...], preferred_element_type=jnp.float32)
    emb = jnp.maximum(emb + wb_ref[H:H + 1, :], 0.0)                     # + b_emb, ReLU
    out_ref[...] = (jnp.dot(emb, wb_ref[:H, :], preferred_element_type=jnp.float32)
                    + wb_ref[H + 1:H + 2, :])                            # + b_pre


def recurrent_kernel(pre_e_ref, h0_ref, slab_ref, out_ref, h_carry, *, H, A):
    """One GRU timestep for one batch shard; weights stay VMEM-resident across the grid."""
    t = pl.program_id(1)
    GB = slab_ref.shape[1] // 2      # 128-aligned lane width of each fused weight block

    @pl.when(t == 0)
    def _():
        h_carry[...] = h0_ref[...]

    h = h_carry[...]                                                     # (BS, H)

    # h-driven block  (lanes 0:GB of slab):   [ w_pre_h (0:H) | w_hh r|z|n (H:4H) | pad ]
    h_mix = (jnp.dot(h, slab_ref[:H, 0:GB], preferred_element_type=jnp.float32)
             + slab_ref[H:H + BS, 0:GB])

    # pre_valpi: relu(pre_e + h-part)   (pre_e already holds emb @ W_pre_e + b_pre)
    se = jnp.maximum(pre_e_ref[...] + h_mix[:, 0:H], 0.0)                # (BS, H)

    # se-driven block (lanes GB:2GB): [ w_pi (0:A) | w_val (A:A+1) | pad | w_ih_eff r|z|n (H:4H) ]
    se_mix = (jnp.dot(se, slab_ref[:H, GB:2 * GB], preferred_element_type=jnp.float32)
              + slab_ref[H:H + BS, GB:2 * GB])

    # GRU gate math — gi / gh slices share identical lane offsets (pure VPU adds)
    r = jax.nn.sigmoid(se_mix[:, H:2 * H] + h_mix[:, H:2 * H])
    z = jax.nn.sigmoid(se_mix[:, 2 * H:3 * H] + h_mix[:, 2 * H:3 * H])
    n = jnp.tanh(se_mix[:, 3 * H:4 * H] + r * h_mix[:, 3 * H:4 * H])
    h_new = (1.0 - z) * n + z * h                                        # (BS, H)

    h_carry[...] = h_new

    pi = se_mix[:, 0:A]
    val = se_mix[:, A:A + 1]
    pad = jnp.zeros((BS, out_ref.shape[1] - (H + A + 1)), jnp.float32)
    out_ref[...] = jnp.concatenate([h_new, pi, val, pad], axis=-1)       # lane-dense store


# --------------------------------------------------------------------------------- packing
def pack_params(params, h_size, output_space):
    """One-time offline repack into (bf16 w_emb, emb_wb, recurrent slab)."""
    H, A = h_size, output_space
    assert A + 1 <= H, "pi|val are packed into the first H lanes of the se-driven block"

    # fold the pi-head contribution of the GRU input weights into an se-driven matrix
    w_ih_se = params["w_ih"][:H, :]                         # (H, 3H)
    w_ih_pi = params["w_ih"][H:, :]                         # (A, 3H)
    w_ih_eff = w_ih_se + params["w_pi"] @ w_ih_pi           # (H, 3H)
    b_ih_eff = params["b_ih"] + params["b_pi"] @ w_ih_pi    # (1, 3H)

    GB = 128 * ((4 * H + 127) // 128)    # lane width of each fused block (128-aligned)

    # recurrent slab: (H + BS, 2*GB); rows 0:H weights, rows H:H+BS biases (pre-broadcast)
    W = jnp.zeros((H, 2 * GB), jnp.float32)
    W = W.at[:, 0:H].set(params["w_pre"][H:, :])            # w_pre_h
    W = W.at[:, H:4 * H].set(params["w_hh"])                # gh weights (r|z|n)
    W = W.at[:, GB:GB + A].set(params["w_pi"])
    W = W.at[:, GB + A:GB + A + 1].set(params["w_val"])
    W = W.at[:, GB + H:GB + 4 * H].set(w_ih_eff)            # gi weights, lane-matched to gh

    b = jnp.zeros((1, 2 * GB), jnp.float32)
    b = b.at[:, H:4 * H].set(params["b_hh"])
    b = b.at[:, GB:GB + A].set(params["b_pi"])
    b = b.at[:, GB + A:GB + A + 1].set(params["b_val"])
    b = b.at[:, GB + H:GB + 4 * H].set(b_ih_eff)
    slab = jnp.concatenate([W, jnp.tile(b, (BS, 1))], axis=0)

    # embedding-phase pack: rows 0:H = w_pre_e, row H = b_emb, row H+1 = b_pre
    wb = jnp.zeros((H + 8, H), jnp.float32)
    wb = wb.at[:H, :].set(params["w_pre"][:H, :])
    wb = wb.at[H, :].set(params["b_emb"][0])
    wb = wb.at[H + 1, :].set(params["b_pre"][0])

    return {"w_emb": params["w_emb"].astype(jnp.bfloat16), "emb_wb": wb, "slab": slab}


# --------------------------------------------------------------------------------- wrapper
@functools.partial(jax.jit, static_argnames=("h_size", "output_space"))
def gru_model_forward_seq(x_seq, h0, packed, *, h_size, output_space):
    """x_seq: (T, B, C, Hs, Ws) NCHW states;  h0: (B, h_size).  Returns (vals, pis, hs)."""
    H, A = h_size, output_space
    T, B = x_seq.shape[0], x_seq.shape[1]

    x_flat = x_seq.reshape(T, B, -1).astype(jnp.bfloat16)   # row-major flatten, like torch .view
    D_in = x_flat.shape[-1]
    h0 = h0.astype(jnp.float32)

    # pad batch to a multiple of the shard size (8 f32 sublanes)
    Bp = BS * ((B + BS - 1) // BS)
    n_shards = Bp // BS
    if Bp != B:
        x_flat = jnp.pad(x_flat, ((0, 0), (0, Bp - B), (0, 0)))
        h0 = jnp.pad(h0, ((0, Bp - B), (0, 0)))

    # ---------------- phase 1: whole-sequence embedding (hoisted out of the recurrence)
    R = T * Bp
    Rt = R if R <= 512 else 512              # row tile (multiple of 8; keeps VMEM tiny)
    R_pad = Rt * pl.cdiv(R, Rt)
    x_rows = x_flat.reshape(R, D_in)
    if R_pad != R:
        x_rows = jnp.pad(x_rows, ((0, R_pad - R), (0, 0)))

    pre_e = pl.pallas_call(
        functools.partial(embed_kernel, H=H),
        out_shape=jax.ShapeDtypeStruct((R_pad, H), jnp.float32),
        grid=(R_pad // Rt,),
        in_specs=[
            pl.BlockSpec((Rt, D_in), lambda i: (i, 0)),
            pl.BlockSpec((D_in, H), lambda i: (0, 0)),          # weights: DMA'd once
            pl.BlockSpec((H + 8, H), lambda i: (0, 0)),
        ],
        out_specs=pl.BlockSpec((Rt, H), lambda i: (i, 0)),
        compiler_params=pltpu.CompilerParams(dimension_semantics=("parallel",)),
    )(x_rows, packed["w_emb"], packed["emb_wb"])
    pre_e = pre_e[:R].reshape(T, Bp, H)

    # ---------------- phase 2: whole-sequence recurrent kernel (weights VMEM-resident)
    out_lanes = 128 * pl.cdiv(H + A + 1, 128)
    out = pl.pallas_call(
        functools.partial(recurrent_kernel, H=H, A=A),
        out_shape=jax.ShapeDtypeStruct((T, Bp, out_lanes), jnp.float32),
        grid=(n_shards, T),
        in_specs=[
            pl.BlockSpec((None, BS, H), lambda s, t: (t, s, 0)),     # pre_e_t for shard s
            pl.BlockSpec((BS, H), lambda s, t: (s, 0)),              # h0 for shard s
            pl.BlockSpec(packed["slab"].shape, lambda s, t: (0, 0)), # slab: DMA'd once
        ],
        out_specs=pl.BlockSpec((None, BS, out_lanes), lambda s, t: (t, s, 0)),
        scratch_shapes=[pltpu.VMEM((BS, H), jnp.float32)],           # h carry across steps
        compiler_params=pltpu.CompilerParams(
            dimension_semantics=("parallel", "arbitrary")),
    )(pre_e, h0, packed["slab"])

    hs = out[:, :B, 0:H]
    pis = out[:, :B, H:H + A]
    vals = out[:, :B, H + A:H + A + 1]
    return vals, pis, hs


def gru_model_forward(x, h, packed, *, h_size, output_space):
    """Single-step forward matching GRUModel.forward(x, h) -> (value, pi, h_new)."""
    vals, pis, hs = gru_model_forward_seq(
        x[None], h, packed, h_size=h_size, output_space=output_space)
    return vals[0], pis[0], hs[0]


# --------------------------------------------------------------------------------- params
def init_params(key, input_space, h_size, output_space):
    """Deterministic synthetic parameters (shapes match the PyTorch module, stored (in,out))."""
    ks = jax.random.split(key, 16)

    def lin(kw, kb, fan_in, fan_out):
        bound = 1.0 / jnp.sqrt(fan_in)
        w = jax.random.uniform(kw, (fan_in, fan_out), jnp.float32, -bound, bound)
        b = jax.random.uniform(kb, (1, fan_out), jnp.float32, -bound, bound)
        return w, b

    w_emb, b_emb = lin(ks[0], ks[1], input_space, h_size)             # Embedder linear
    w_pre, b_pre = lin(ks[2], ks[3], 2 * h_size, h_size)              # pre_valpi Linear(2H, H)
    w_pi, b_pi = lin(ks[4], ks[5], h_size, output_space)              # pi head
    w_val, b_val = lin(ks[6], ks[7], h_size, 1)                       # value head
    w_ih, b_ih = lin(ks[8], ks[9], h_size + output_space, 3 * h_size) # GRUCell, gate order r|z|n
    w_hh, b_hh = lin(ks[10], ks[11], h_size, 3 * h_size)
    h_init = jax.random.normal(ks[12], (1, h_size), jnp.float32) / jnp.sqrt(h_size)

    return dict(w_emb=w_emb, b_emb=b_emb, w_pre=w_pre, b_pre=b_pre,
                w_pi=w_pi, b_pi=b_pi, w_val=w_val, b_val=b_val,
                w_ih=w_ih, b_ih=b_ih, w_hh=w_hh, b_hh=b_hh, h_init=h_init)


# --------------------------------------------------------------------------------- reference
def reference_forward_step(x, h, p):
    """Pure-JAX reference for one GRUModel.forward step (emb matmul in bf16 like the kernel)."""
    B = x.shape[0]
    xf = x.reshape(B, -1)
    emb = jnp.dot(xf.astype(jnp.bfloat16), p["w_emb"].astype(jnp.bfloat16),
                  preferred_element_type=jnp.float32)
    emb = jnp.maximum(emb + p["b_emb"], 0.0)
    se = jnp.maximum(jnp.concatenate([emb, h], -1) @ p["w_pre"] + p["b_pre"], 0.0)
    pi = se @ p["w_pi"] + p["b_pi"]
    val = se @ p["w_val"] + p["b_val"]
    rnn_in = jnp.concatenate([se, pi], -1)
    gi = rnn_in @ p["w_ih"] + p["b_ih"]
    gh = h @ p["w_hh"] + p["b_hh"]
    H = h.shape[-1]
    r = jax.nn.sigmoid(gi[:, :H] + gh[:, :H])
    z = jax.nn.sigmoid(gi[:, H:2 * H] + gh[:, H:2 * H])
    n = jnp.tanh(gi[:, 2 * H:] + r * gh[:, 2 * H:])
    h_new = (1 - z) * n + z * h
    return val, pi, h_new


# --------------------------------------------------------------------------------- main
if __name__ == "__main__":
    T, B, C, Hs, Ws = 8, 2, 4, 16, 16
    input_space = C * Hs * Ws            # 1024
    h_size = 32
    output_space = 4                     # action dim

    key = jax.random.PRNGKey(0)
    k_x, k_p = jax.random.split(key)

    x_seq = jax.random.normal(k_x, (T, B, C, Hs, Ws), jnp.float32)
    params = init_params(k_p, input_space, h_size, output_space)
    h0 = jnp.tile(params["h_init"], (B, 1))      # fresh_h(batch_size=B)

    packed = pack_params(params, h_size, output_space)   # one-time offline repack
    jax.block_until_ready(packed)

    # sequence path: T applications of GRUModel.forward fused into two pallas_calls
    vals, pis, hs = gru_model_forward_seq(
        x_seq, h0, packed, h_size=h_size, output_space=output_space)
    jax.block_until_ready((vals, pis, hs))

    assert vals.shape == (T, B, 1) and pis.shape == (T, B, output_space)
    assert hs.shape == (T, B, h_size)

    # per-step pure-JAX reference (folded weights re-associate sums -> small tolerance)
    h_r = h0
    max_err = 0.0
    for t in range(T):
        v_r, p_r, h_r = reference_forward_step(x_seq[t], h_r, params)
        max_err = max(max_err,
                      float(jnp.max(jnp.abs(vals[t] - v_r))),
                      float(jnp.max(jnp.abs(pis[t] - p_r))),
                      float(jnp.max(jnp.abs(hs[t] - h_r))))
    assert max_err < 2e-4, f"sequence max abs err {max_err}"

    # single-step call with the exact GRUModel.forward(x, h) signature
    val1, pi1, h1 = gru_model_forward(
        x_seq[0], h0, packed, h_size=h_size, output_space=output_space)
    jax.block_until_ready((val1, pi1, h1))
    v_r0, p_r0, h_r0 = reference_forward_step(x_seq[0], h0, params)
    assert jnp.allclose(val1, v_r0, atol=1e-4)
    assert jnp.allclose(pi1, p_r0, atol=1e-4)
    assert jnp.allclose(h1, h_r0, atol=1e-4)

    print("KERNEL_OK")
</pallas_src>

<mosaic_0001>
module attributes {stable_mosaic.version = 11 : i64} {
  func.func @embed_kernel(%arg0: i32, %arg1: memref<64x1024xbf16, #tpu.memory_space<vmem>>, %arg2: memref<1024x32xbf16, #tpu.memory_space<vmem>>, %arg3: memref<40x32xf32, #tpu.memory_space<vmem>>, %arg4: memref<64x32xf32, #tpu.memory_space<vmem>>) attributes {dimension_semantics = [#tpu.dimension_semantics<parallel>], iteration_bounds = array<i64: 1>, scalar_prefetch = 0 : i64, scratch_operands = 0 : i64, tpu.core_type = #tpu.core_type<tc>, window_params = [{transform_indices = @transform_0, window_bounds = array<i64: 64, 1024>}, {pipeline_mode = #tpu.pipeline_mode<synchronous>, transform_indices = @transform_1, window_bounds = array<i64: 1024, 32>}, {pipeline_mode = #tpu.pipeline_mode<synchronous>, transform_indices = @transform_2, window_bounds = array<i64: 40, 32>}, {transform_indices = @transform_3, window_bounds = array<i64: 64, 32>}]} {
    %c0 = arith.constant 0 : index
    %c0_0 = arith.constant 0 : index
    %0 = vector.load %arg1[%c0, %c0_0] : memref<64x1024xbf16, #tpu.memory_space<vmem>>, vector<64x1024xbf16>
    %c0_1 = arith.constant 0 : index
    %c0_2 = arith.constant 0 : index
    %1 = vector.load %arg2[%c0_1, %c0_2] : memref<1024x32xbf16, #tpu.memory_space<vmem>>, vector<1024x32xbf16>
    %cst = arith.constant dense<0.000000e+00> : vector<64x32xf32>
    %2 = tpu.matmul %0, %1, %cst {dimension_numbers = #tpu.dot_dimension_numbers<[1], [0], [0], [1], [0, 0, 1, 1], [], []>} : vector<64x1024xbf16>, vector<1024x32xbf16>, vector<64x32xf32> -> vector<64x32xf32>
    %c32 = arith.constant 32 : index
    %c0_3 = arith.constant 0 : index
    %3 = vector.load %arg3[%c32, %c0_3] : memref<40x32xf32, #tpu.memory_space<vmem>>, vector<1x32xf32>
    %4 = vector.broadcast %3 : vector<1x32xf32> to vector<64x32xf32>
    %5 = arith.addf %2, %4 : vector<64x32xf32>
    %cst_4 = arith.constant 0.000000e+00 : f32
    %6 = vector.broadcast %cst_4 : f32 to vector<64x32xf32>
    %7 = arith.maximumf %5, %6 : vector<64x32xf32>
    %c0_5 = arith.constant 0 : index
    %c0_6 = arith.constant 0 : index
    %8 = vector.load %arg3[%c0_5, %c0_6] : memref<40x32xf32, #tpu.memory_space<vmem>>, vector<32x32xf32>
    %cst_7 = arith.constant dense<0.000000e+00> : vector<64x32xf32>
    %9 = tpu.matmul %7, %8, %cst_7 {dimension_numbers = #tpu.dot_dimension_numbers<[1], [0], [0], [1], [0, 0, 1, 1], [], []>} : vector<64x32xf32>, vector<32x32xf32>, vector<64x32xf32> -> vector<64x32xf32>
    %c33 = arith.constant 33 : index
    %c0_8 = arith.constant 0 : index
    %10 = vector.load %arg3[%c33, %c0_8] : memref<40x32xf32, #tpu.memory_space<vmem>>, vector<1x32xf32>
    %11 = vector.broadcast %10 : vector<1x32xf32> to vector<64x32xf32>
    %12 = arith.addf %9, %11 : vector<64x32xf32>
    %c0_9 = arith.constant 0 : index
    %c0_10 = arith.constant 0 : index
    %13 = vector.load %arg4[%c0_9, %c0_10] : memref<64x32xf32, #tpu.memory_space<vmem>>, vector<64x32xf32>
    tpu.vector_store %arg4[%c0_9, %c0_10], %12 {strides = array<i32>} : memref<64x32xf32, #tpu.memory_space<vmem>>, vector<64x32xf32>,
    return
  }
  func.func @transform_0(%arg0: i32) -> (i32, i32) {
    %c0_i32 = arith.constant 0 : i32
    %c0_i32_0 = arith.constant 0 : i32
    return %arg0, %c0_i32 : i32, i32
  }
  func.func @transform_1(%arg0: i32) -> (i32, i32) {
    %c0_i32 = arith.constant 0 : i32
    %c0_i32_0 = arith.constant 0 : i32
    %c0_i32_1 = arith.constant 0 : i32
    return %c0_i32, %c0_i32_0 : i32, i32
  }
  func.func @transform_2(%arg0: i32) -> (i32, i32) {
    %c0_i32 = arith.constant 0 : i32
    %c0_i32_0 = arith.constant 0 : i32
    %c0_i32_1 = arith.constant 0 : i32
    return %c0_i32, %c0_i32_0 : i32, i32
  }
  func.func @transform_3(%arg0: i32) -> (i32, i32) {
    %c0_i32 = arith.constant 0 : i32
    %c0_i32_0 = arith.constant 0 : i32
    return %arg0, %c0_i32 : i32, i32
  }
}

module attributes {stable_mosaic.version = 11 : i64} {
  func.func @recurrent_kernel(%arg0: i32, %arg1: i32, %arg2: memref<1x8x32xf32, #tpu.memory_space<vmem>>, %arg3: memref<8x32xf32, #tpu.memory_space<vmem>>, %arg4: memref<40x256xf32, #tpu.memory_space<vmem>>, %arg5: memref<1x8x128xf32, #tpu.memory_space<vmem>>, %arg6: memref<8x32xf32, #tpu.memory_space<vmem>>) attributes {dimension_semantics = [#tpu.dimension_semantics<parallel>, #tpu.dimension_semantics<arbitrary>], iteration_bounds = array<i64: 1, 8>, scalar_prefetch = 0 : i64, scratch_operands = 1 : i64, tpu.core_type = #tpu.core_type<tc>, window_params = [{transform_indices = @transform_0, window_bounds = array<i64: 1, 8, 32>}, {transform_indices = @transform_1, window_bounds = array<i64: 8, 32>}, {pipeline_mode = #tpu.pipeline_mode<synchronous>, transform_indices = @transform_2, window_bounds = array<i64: 40, 256>}, {transform_indices = @transform_3, window_bounds = array<i64: 1, 8, 128>}]} {
    %c0_i32 = arith.constant 0 : i32
    %0 = arith.cmpi eq, %arg1, %c0_i32 : i32
    %1 = arith.extui %0 : i1 to i32
    %c0_i32_0 = arith.constant 0 : i32
    %2 = arith.cmpi ne, %1, %c0_i32_0 : i32
    scf.if %2 {
      %c0_22 = arith.constant 0 : index
      %c0_23 = arith.constant 0 : index
      %52 = vector.load %arg3[%c0_22, %c0_23] : memref<8x32xf32, #tpu.memory_space<vmem>>, vector<8x32xf32>
      %c0_24 = arith.constant 0 : index
      %c0_25 = arith.constant 0 : index
      %53 = vector.load %arg6[%c0_24, %c0_25] : memref<8x32xf32, #tpu.memory_space<vmem>>, vector<8x32xf32>
      tpu.vector_store %arg6[%c0_24, %c0_25], %52 {strides = array<i32>} : memref<8x32xf32, #tpu.memory_space<vmem>>, vector<8x32xf32>,
    } else {
    }
    %c0 = arith.constant 0 : index
    %c0_1 = arith.constant 0 : index
    %3 = vector.load %arg6[%c0, %c0_1] : memref<8x32xf32, #tpu.memory_space<vmem>>, vector<8x32xf32>
    %c0_2 = arith.constant 0 : index
    %c0_3 = arith.constant 0 : index
    %4 = vector.load %arg4[%c0_2, %c0_3] : memref<40x256xf32, #tpu.memory_space<vmem>>, vector<32x128xf32>
    %cst = arith.constant dense<0.000000e+00> : vector<8x128xf32>
    %5 = tpu.matmul %3, %4, %cst {dimension_numbers = #tpu.dot_dimension_numbers<[1], [0], [0], [1], [0, 0, 1, 1], [], []>} : vector<8x32xf32>, vector<32x128xf32>, vector<8x128xf32> -> vector<8x128xf32>
    %c32 = arith.constant 32 : index
    %c0_4 = arith.constant 0 : index
    %6 = vector.load %arg4[%c32, %c0_4] : memref<40x256xf32, #tpu.memory_space<vmem>>, vector<8x128xf32>
    %7 = arith.addf %5, %6 : vector<8x128xf32>
    %c0_5 = arith.constant 0 : index
    %c0_6 = arith.constant 0 : index
    %c0_7 = arith.constant 0 : index
    %8 = vector.load %arg2[%c0_5, %c0_6, %c0_7] : memref<1x8x32xf32, #tpu.memory_space<vmem>>, vector<1x8x32xf32>
    %9 = vector.shape_cast %8 : vector<1x8x32xf32> to vector<8x32xf32>
    %10 = vector.extract_strided_slice %7 {offsets = [0, 0], sizes = [8, 32], strides = [1, 1]} : vector<8x128xf32> to vector<8x32xf32>
    %11 = arith.addf %9, %10 : vector<8x32xf32>
    %cst_8 = arith.constant 0.000000e+00 : f32
    %12 = vector.broadcast %cst_8 : f32 to vector<8x32xf32>
    %13 = arith.maximumf %11, %12 : vector<8x32xf32>
    %c0_9 = arith.constant 0 : index
    %c128 = arith.constant 128 : index
    %14 = vector.load %arg4[%c0_9, %c128] : memref<40x256xf32, #tpu.memory_space<vmem>>, vector<32x128xf32>
    %cst_10 = arith.constant dense<0.000000e+00> : vector<8x128xf32>
    %15 = tpu.matmul %13, %14, %cst_10 {dimension_numbers = #tpu.dot_dimension_numbers<[1], [0], [0], [1], [0, 0, 1, 1], [], []>} : vector<8x32xf32>, vector<32x128xf32>, vector<8x128xf32> -> vector<8x128xf32>
    %c32_11 = arith.constant 32 : index
    %c128_12 = arith.constant 128 : index
    %16 = vector.load %arg4[%c32_11, %c128_12] : memref<40x256xf32, #tpu.memory_space<vmem>>, vector<8x128xf32>
    %17 = arith.addf %15, %16 : vector<8x128xf32>
    %18 = vector.extract_strided_slice %17 {offsets = [0, 32], sizes = [8, 32], strides = [1, 1]} : vector<8x128xf32> to vector<8x32xf32>
    %19 = vector.extract_strided_slice %7 {offsets = [0, 32], sizes = [8, 32], strides = [1, 1]} : vector<8x128xf32> to vector<8x32xf32>
    %20 = arith.addf %18, %19 : vector<8x32xf32>
    %21 = arith.negf %20 : vector<8x32xf32>
    %22 = math.exp %21 : vector<8x32xf32>
    %cst_13 = arith.constant 1.000000e+00 : f32
    %23 = vector.broadcast %cst_13 : f32 to vector<8x32xf32>
    %24 = arith.addf %23, %22 : vector<8x32xf32>
    %25 = arith.divf %23, %24 : vector<8x32xf32>
    %26 = vector.extract_strided_slice %17 {offsets = [0, 64], sizes = [8, 32], strides = [1, 1]} : vector<8x128xf32> to vector<8x32xf32>
    %27 = vector.extract_strided_slice %7 {offsets = [0, 64], sizes = [8, 32], strides = [1, 1]} : vector<8x128xf32> to vector<8x32xf32>
    %28 = arith.addf %26, %27 : vector<8x32xf32>
    %29 = arith.negf %28 : vector<8x32xf32>
    %30 = math.exp %29 : vector<8x32xf32>
    %cst_14 = arith.constant 1.000000e+00 : f32
    %31 = vector.broadcast %cst_14 : f32 to vector<8x32xf32>
    %32 = arith.addf %31, %30 : vector<8x32xf32>
    %33 = arith.divf %31, %32 : vector<8x32xf32>
    %34 = vector.extract_strided_slice %17 {offsets = [0, 96], sizes = [8, 32], strides = [1, 1]} : vector<8x128xf32> to vector<8x32xf32>
    %35 = vector.extract_strided_slice %7 {offsets = [0, 96], sizes = [8, 32], strides = [1, 1]} : vector<8x128xf32> to vector<8x32xf32>
    %36 = arith.mulf %25, %35 : vector<8x32xf32>
    %37 = arith.addf %34, %36 : vector<8x32xf32>
    %38 = math.tanh %37 : vector<8x32xf32>
    %cst_15 = arith.constant 1.000000e+00 : f32
    %39 = vector.broadcast %cst_15 : f32 to vector<8x32xf32>
    %40 = arith.subf %39, %33 : vector<8x32xf32>
    %41 = arith.mulf %40, %38 : vector<8x32xf32>
    %42 = arith.mulf %33, %3 : vector<8x32xf32>
    %43 = arith.addf %41, %42 : vector<8x32xf32>
    %c0_16 = arith.constant 0 : index
    %c0_17 = arith.constant 0 : index
    %44 = vector.load %arg6[%c0_16, %c0_17] : memref<8x32xf32, #tpu.memory_space<vmem>>, vector<8x32xf32>
    tpu.vector_store %arg6[%c0_16, %c0_17], %43 {strides = array<i32>} : memref<8x32xf32, #tpu.memory_space<vmem>>, vector<8x32xf32>,
    %45 = vector.extract_strided_slice %17 {offsets = [0, 0], sizes = [8, 4], strides = [1, 1]} : vector<8x128xf32> to vector<8x4xf32>
    %46 = vector.extract_strided_slice %17 {offsets = [0, 4], sizes = [8, 1], strides = [1, 1]} : vector<8x128xf32> to vector<8x1xf32>
    %cst_18 = arith.constant 0.000000e+00 : f32
    %47 = vector.broadcast %cst_18 : f32 to vector<8x91xf32>
    %48 = tpu.concatenate %43, %45, %46, %47 in 1 : vector<8x32xf32>, vector<8x4xf32>, vector<8x1xf32>, vector<8x91xf32> -> vector<8x128xf32>
    %c0_19 = arith.constant 0 : index
    %c0_20 = arith.constant 0 : index
    %c0_21 = arith.constant 0 : index
    %49 = vector.load %arg5[%c0_19, %c0_20, %c0_21] : memref<1x8x128xf32, #tpu.memory_space<vmem>>, vector<1x8x128xf32>
    %50 = vector.shape_cast %49 : vector<1x8x128xf32> to vector<8x128xf32>
    %51 = vector.shape_cast %48 : vector<8x128xf32> to vector<1x8x128xf32>
    tpu.vector_store %arg5[%c0_19, %c0_20, %c0_21], %51 {strides = array<i32>} : memref<1x8x128xf32, #tpu.memory_space<vmem>>, vector<1x8x128xf32>,
    return
  }
  func.func @transform_0(%arg0: i32, %arg1: i32) -> (i32, i32, i32) {
    %c0_i32 = arith.constant 0 : i32
    %c0_i32_0 = arith.constant 0 : i32
    return %arg1, %arg0, %c0_i32 : i32, i32, i32
  }
  func.func @transform_1(%arg0: i32, %arg1: i32) -> (i32, i32) {
    %c0_i32 = arith.constant 0 : i32
    %c0_i32_0 = arith.constant 0 : i32
    return %arg0, %c0_i32 : i32, i32
  }
  func.func @transform_2(%arg0: i32, %arg1: i32) -> (i32, i32) {
    %c0_i32 = arith.constant 0 : i32
    %c0_i32_0 = arith.constant 0 : i32
    %c0_i32_1 = arith.constant 0 : i32
    return %c0_i32, %c0_i32_0 : i32, i32
  }
  func.func @transform_3(%arg0: i32, %arg1: i32) -> (i32, i32, i32) {
    %c0_i32 = arith.constant 0 : i32
    %c0_i32_0 = arith.constant 0 : i32
    return %arg1, %arg0, %c0_i32 : i32, i32, i32
  }
}

</mosaic_0001>

<bundles_post_ra>
// kernel: gru_model_forward_seq.3
= control target key start
LH: loop header
LB: loop body
LE: loop exit
PB: predicated region body
PF: predicated region fallthrough
CT: control target
= control target key end

     0   :  { %s660_s12 = smov 0   ;;  %s662_s13 = smov 0   ;;  %s740_s0 = inlined_call_operand.vmem [shape: f32[8,8,32], index: 0, kind: input, shape index: {}]   ;;  %s741_s1 = inlined_call_operand.vmem [shape: f32[8,32], index: 1, kind: input, shape index: {}]   ;;  %s742_s2 = inlined_call_operand.vmem [shape: f32[40,256], index: 2, kind: input, shape index: {}]   ;;  %s743_s3 = inlined_call_operand.vmem [shape: f32[8,8,128], index: 3, kind: output, shape index: {}]  }
   0x1   :  { %s664_s14 = smov 0  }
   0x2 LB: > { %s22_s15 = sadd.s32 1, %s628_s13  ;;  %p521_p0 = scmp.ge.s32.totalorder %s632_s14, 1  ;;  %s632_s14 = sphi %s664_s14, %s13_s14   ;;  %s628_s13 = sphi %s662_s13, %s745_s13   ;;  %s624_s12 = sphi %s660_s12, %s744_s12  }
   0x3   : > { %p23_p1 = scmp.ge.s32.totalorder %s22_s15, 8  ;;  %p164_p2 = scmp.lt.s32.totalorder %s632_s14, 9 }
   0x5   : > { %s747_s15 = smov (%p23_p1, %s22_s15), 0  ;;  %p165_p3 = pnand %p521_p0, %p164_p2 }
   0x6   : > { %p196_p4 = scmp.lt.s32.totalorder (!%p165_p3), %s624_s12, 7  ;;  %p524_p5 = scmp.ne.s32.totalorder (!%p165_p3), %s624_s12, 0 }
   0x7   : > { %168 = sbr.rel (%p165_p3) target bundleno = 864 (0x360), region = 32 }
   0xe   : > { %s197_s16 = scalar_select %p196_p4, %s624_s12, 7 }
   0xf   : > { %217 = sbr.rel (%p524_p5) target bundleno = 22 (0x16), region = 36  ;;  %v218_v0 = vld [vmem:[%s741_s1] sm:$0xff] (!%p524_p5)  ;;  %vm219_vm0 = vcmask (!%p524_p5), 261120  }
  0x10   : > { %s522_s17 = sshll.u32 %s197_s16, 3  ;;  %220 = vst.msk [vmem:[#allocation2] sm:$0xff] (!%p524_p5), %vm219_vm0, %v218_v0 }
  0x11   : > { %s681_s20 = scalar_lea.vmem %s740_s0, %s522_s17  ;;  %s686_s23 = scalar_lea.vmem %s743_s3, %s522_s17 }
  0x16 PF: > { %v222_v1 = vld [vmem:[%s742_s2] sm:$0xff]  ;;  %v223_v2 = vld [vmem:[%s742_s2 + $0x10] sm:$0xff]  ;;  %v634_v4 = vmov 0.0|0.0   ;;  %vm635_vm1 = vmmov 0   ;;  %v636_v7 = vmov 0.0   ;;  %vm227_vm2 = vcmask 261120  }
  0x17   : > { %v224_v3 = vld [vmem:[%s742_s2 + $0x20] sm:$0xff]  ;;  %562 = vmatprep.subr.bf16.mxu0 %v634_v4  ;;  %v563_v5 = vpack.c.bf16 %v223_v2, %v222_v1  ;;  %v225_v6 = vld [vmem:[%s742_s2 + $0x30] sm:$0xff]  ;;  %548 = vmatprep.mubr.msk.f32.mxu0 %vm635_vm1, %v636_v7  ;;  %v304_v10 = vld [vmem:[%s742_s2 + $0x8] sm:$0xff]  ;;  %s637_s21 = smov 64   ;;  %s639_s25 = smov 32   ;;  %vm421_vm3 = vcmask 293888  }
  0x18   : > { %568 = vmatprep.subr.bf16.mxu1 %v634_v4  ;;  %559 = vmatprep.mubr.msk.f32.mxu1 %vm635_vm1, %v636_v7  ;;  %v566_v8 = vpack.c.bf16 %v225_v6, %v224_v3  ;;  %v221_v9 = vld [vmem:[#allocation2] sm:$0xff]  ;;  %v305_v11 = vld [vmem:[%s742_s2 + $0x18] sm:$0xff]  ;;  %v306_v13 = vld [vmem:[%s742_s2 + $0x28] sm:$0xff]  ;;  %vm423_vm4 = vcmask 302080  }
  0x19   : > { %564 = vmatpush3.bf16.msra.mxu0 %v563_v5  ;;  %v569_v12 = vpack.c.bf16 %v305_v11, %v304_v10  ;;  %v307_v14 = vld [vmem:[%s742_s2 + $0x38] sm:$0xff]  ;;  %v226_v16 = vld [vmem:[%s742_s2 + $0x40] sm:$0xff]  ;;  %v308_v23 = vld [vmem:[%s742_s2 + $0x48] sm:$0xff] }
  0x1a   : > { %565 = vmatprep.subr.bf16.mxu0 %v634_v4  ;;  %v572_v15 = vpack.c.bf16 %v307_v14, %v306_v13  ;;  %v301_v18 = vld [vmem:[%s681_s20] sm:$0xff]  ;;  %s638_s20 = smov 96  }
  0x1b   : > { %570 = vmatpush3.bf16.msra.mxu1 %v569_v12 }
  0x1c   : > { %571 = vmatprep.subr.bf16.mxu1 %v634_v4 }
  0x1d   : > { %567 = vmatpush3.bf16.msra.mxu0 %v566_v8 }
  0x1f   : > { %573 = vmatpush3.bf16.msra.mxu1 %v572_v15 }
  0x20   : > { %549 = vmatmul.mubr.msk.f32.vlgmr.msra.gmra.mrb[0].mxu0 %vm227_vm2, %v221_v9 }
  0xf3   : > { %v297_v17 = vpop.f32.mrb[0].mxu0 }
  0xf4   : > { %v298_v19 = vadd.f32 %v297_v17, %v226_v16  ;;  %v550_v20 = vpop.f32.mrb[1].mxu0 }
  0xf6   : > { %v302_v21 = vadd.f32 %v301_v18, %v298_v19  ;;  %390 = vrot.lane.b32.xlu0 %v298_v19, %s637_s21 }
  0xf8   : > { %v303_v22 = vmax.f32 %v302_v21, 0.0 }
  0xfa   : > { %560 = vmatmul.mubr.msk.f32.vlgmr.msra.gmra.mrb[0].mxu1 %vm227_vm2, %v303_v22 }
 0x168   : > { %v391_v32 = vpop.permute.xlu0 %390 }
 0x1cd   : > { %v378_v24 = vpop.f32.mrb[0].mxu1 }
 0x1ce   : > { %v379_v25 = vadd.f32 %v378_v24, %v308_v23  ;;  %v561_v26 = vpop.f32.mrb[1].mxu1 }
 0x1d0   : > { %v382_v27 = vadd.f32 %v379_v25, %v298_v19 }
 0x1d2   : > { %v527_v28 = vmul.f32 -1.442695, %v382_v27 }
 0x1d4   : > { %604 = vpow2.f32 %v527_v28 }
 0x1de   : > { %v605_v29 = vpop.eup %604 }
 0x1df   : > { %v386_v30 = vadd.f32 1.0, %v605_v29 }
 0x1e1   : > { %606 = vrcp.f32 %v386_v30 }
 0x1eb   : > { %v607_v31 = vpop.eup %606 }
 0x1ec   : > { %v393_v33 = vmul.f32 %v607_v31, %v391_v32  ;;  %v400_v38 = vsub.f32 1.0, %v607_v31 }
 0x1ee   : > { %395 = vrot.lane.b32.xlu0 %v393_v33, %s637_s21 }
 0x260   : > { %v396_v34 = vpop.permute.xlu0 %395 }
 0x261   : > { %v398_v35 = vadd.f32 %v396_v34, %v379_v25 }
 0x263   : > { %608 = vtanh.f32 %v398_v35 }
 0x26d   : > { %v609_v36 = vpop.eup %608 }
 0x26e   : > { %402 = vrot.lane.b32.xlu1 %v609_v36, %s638_s20 }
 0x272   : > { %406 = vrot.lane.b32.xlu1 %v221_v9, %s637_s21 }
 0x276   : > { %417 = vrot.lane.b32.xlu1 %v379_v25, %s639_s25 }
 0x2e0   : > { %v403_v37 = vpop.permute.xlu1 %402 }
 0x2e1   : > { %v405_v40 = vmul.f32 %v403_v37, %v400_v38 }
 0x2e4   : > { %v407_v39 = vpop.permute.xlu1 %406 }
 0x2e5   : > { %v409_v41 = vmul.f32 %v607_v31, %v407_v39 }
 0x2e7   : > { %v410_v42 = vadd.f32 %v409_v41, %v405_v40 }
 0x2e8   : > { %v418_v43 = vpop.permute.xlu1 %417 }
 0x2e9   : > { %412 = vrot.lane.b32.xlu0 %v410_v42, %s637_s21 }
 0x35b   : > { %v413_v44 = vpop.permute.xlu0 %412 }
 0x35c   : > { %415 = vst.msk [vmem:[#allocation2] sm:$0xff] %vm227_vm2, %v413_v44  ;;  %v420_v45 = vsel %vm227_vm2, %v413_v44, %v418_v43 }
 0x35d   : > { %v422_v46 = vsel %vm421_vm3, %v420_v45, %v418_v43 }
 0x35e   : > { %v424_v47 = vsel %vm423_vm4, %v422_v46, 0.0 }
 0x35f   : > { %425 = vst [vmem:[%s686_s23] sm:$0xff] %v424_v47 }
 0x360 PF: > { %s13_s14 = sadd.s32 1, %s632_s14   ;;  %s744_s12 = smov %s628_s13 }
 0x361   : > { %p10_p6 = scmp.ge.s32.totalorder %s13_s14, 10   ;;  %s745_s13 = smov %s747_s15 }
 0x363   :  { %12 = sbr.rel (!%p10_p6) target bundleno = 2 (0x2), region = 69 }

// kernel: gru_model_forward_seq.2
= control target key start
LH: loop header
LB: loop body
LE: loop exit
PB: predicated region body
PF: predicated region fallthrough
CT: control target
= control target key end

     0   :  { %vm1001_vm0 = vcmask 261120   ;;  %s1904_s1 = inlined_call_operand.vmem [shape: bf16[1024,32], index: 1, kind: input, shape index: {}]   ;;  %s1905_s0 = inlined_call_operand.vmem [shape: bf16[64,1024], index: 0, kind: input, shape index: {}]   ;;  %s1906_s2 = inlined_call_operand.vmem [shape: f32[40,32], index: 2, kind: input, shape index: {}]   ;;  %s1907_s3 = inlined_call_operand.vmem [shape: f32[64,32], index: 3, kind: output, shape index: {}]  }
   0x1   :  { %v1453_v0 = vld [vmem:[%s1904_s1 + $0x40] sm:$0xff]   ;;  %v1457_v4 = vld [vmem:[%s1904_s1 + $0x48] sm:$0xff]   ;;  %v1461_v8 = vld [vmem:[%s1904_s1 + $0x50] sm:$0xff]  }
   0x2   :  { %v1454_v1 = vld [vmem:[%s1904_s1 + $0xc0] sm:$0xff]   ;;  %1249 = vmatprep.subr.bf16.mxu0 %v1453_v0  ;;  %v1458_v5 = vld [vmem:[%s1904_s1 + $0xc8] sm:$0xff]   ;;  %v1462_v9 = vld [vmem:[%s1904_s1 + $0xd0] sm:$0xff]  }
   0x3   :  { %v1455_v2 = vld [vmem:[%s1904_s1] sm:$0xff]   ;;  %1289 = vmatprep.subr.bf16.mxu1 %v1454_v1  ;;  %v1459_v6 = vld [vmem:[%s1904_s1 + $0x8] sm:$0xff]   ;;  %v1463_v10 = vld [vmem:[%s1904_s1 + $0x10] sm:$0xff]  }
   0x4   :  { %v1456_v3 = vld [vmem:[%s1904_s1 + $0x80] sm:$0xff]   ;;  %1250 = vmatpush3.bf16.msra.mxu0 %v1455_v2  ;;  %v1460_v7 = vld [vmem:[%s1904_s1 + $0x88] sm:$0xff]   ;;  %v1464_v11 = vld [vmem:[%s1904_s1 + $0x90] sm:$0xff]  }
   0x5   :  { %1290 = vmatpush3.bf16.msra.mxu1 %v1456_v3  ;;  %1251 = vmatprep.subr.bf16.mxu0 %v1457_v4  ;;  %v1465_v12 = vld [vmem:[%s1904_s1 + $0x58] sm:$0xff]   ;;  %v1469_v16 = vld [vmem:[%s1904_s1 + $0x60] sm:$0xff]   ;;  %v1473_v20 = vld [vmem:[%s1904_s1 + $0x68] sm:$0xff]  }
   0x6   :  { %1291 = vmatprep.subr.bf16.mxu1 %v1458_v5  ;;  %v1466_v13 = vld [vmem:[%s1904_s1 + $0xd8] sm:$0xff]   ;;  %v1470_v17 = vld [vmem:[%s1904_s1 + $0xe0] sm:$0xff]   ;;  %v1474_v21 = vld [vmem:[%s1904_s1 + $0xe8] sm:$0xff]  }
   0x7   :  { %v1467_v14 = vld [vmem:[%s1904_s1 + $0x18] sm:$0xff]   ;;  %v1471_v18 = vld [vmem:[%s1904_s1 + $0x20] sm:$0xff]   ;;  %v1475_v22 = vld [vmem:[%s1904_s1 + $0x28] sm:$0xff]  }
   0x8   :  { %1252 = vmatpush3.bf16.msra.mxu0 %v1459_v6  ;;  %v1468_v15 = vld [vmem:[%s1904_s1 + $0x98] sm:$0xff]   ;;  %v1472_v19 = vld [vmem:[%s1904_s1 + $0xa0] sm:$0xff]   ;;  %v1476_v23 = vld [vmem:[%s1904_s1 + $0xa8] sm:$0xff]  }
   0x9   :  { %1292 = vmatpush3.bf16.msra.mxu1 %v1460_v7  ;;  %1253 = vmatprep.subr.bf16.mxu0 %v1461_v8  ;;  %v1477_v24 = vld [vmem:[%s1904_s1 + $0x70] sm:$0xff]   ;;  %v1481_v28 = vld [vmem:[%s1904_s1 + $0x78] sm:$0xff]   ;;  %v15_v32 = vld [vmem:[%s1905_s0] sm:$0xff] }
   0xa   :  { %1293 = vmatprep.subr.bf16.mxu1 %v1462_v9  ;;  %v1478_v25 = vld [vmem:[%s1904_s1 + $0xf0] sm:$0xff]   ;;  %v1482_v29 = vld [vmem:[%s1904_s1 + $0xf8] sm:$0xff]   ;;  %v19_v33 = vld [vmem:[%s1905_s0 + $0x20] sm:$0xff] }
   0xb   :  { %v1479_v26 = vld [vmem:[%s1904_s1 + $0x30] sm:$0xff]   ;;  %v1483_v30 = vld [vmem:[%s1904_s1 + $0x38] sm:$0xff]   ;;  %v16_v34 = vld [vmem:[%s1905_s0 + $0x8] sm:$0xff]  ;;  %v1144_v35 = vcombine.low %v15_v32, %v19_v33  ;;  %v1145_v36 = vcombine.high %v15_v32, %v19_v33 }
   0xc   :  { %1254 = vmatpush3.bf16.msra.mxu0 %v1463_v10  ;;  %v1480_v27 = vld [vmem:[%s1904_s1 + $0xb0] sm:$0xff]   ;;  %v1484_v31 = vld [vmem:[%s1904_s1 + $0xb8] sm:$0xff]   ;;  %v20_v37 = vld [vmem:[%s1905_s0 + $0x28] sm:$0xff] }
   0xd   :  { %1294 = vmatpush3.bf16.msra.mxu1 %v1464_v11  ;;  %1255 = vmatprep.subr.bf16.mxu0 %v1465_v12  ;;  %v1146_v38 = vcombine.low %v16_v34, %v20_v37  ;;  %v1147_v39 = vcombine.high %v16_v34, %v20_v37  ;;  %v1485_v40 = vld [vmem:[%s1904_s1 + $0x140] sm:$0xff]   ;;  %v1489_v44 = vld [vmem:[%s1904_s1 + $0x148] sm:$0xff]   ;;  %v1493_v56 = vld [vmem:[%s1904_s1 + $0x150] sm:$0xff]  }
   0xe   :  { %1295 = vmatprep.subr.bf16.mxu1 %v1466_v13  ;;  %756 = vmatprep.mubr.bf16.mxu0 %v1145_v36  ;;  %v1486_v41 = vld [vmem:[%s1904_s1 + $0x1c0] sm:$0xff]   ;;  %v1490_v45 = vld [vmem:[%s1904_s1 + $0x1c8] sm:$0xff]   ;;  %v1494_v57 = vld [vmem:[%s1904_s1 + $0x1d0] sm:$0xff]  }
   0xf   :  { %821 = vmatprep.mubr.bf16.mxu1 %v1147_v39  ;;  %v1487_v42 = vld [vmem:[%s1904_s1 + $0x100] sm:$0xff]   ;;  %v1491_v46 = vld [vmem:[%s1904_s1 + $0x108] sm:$0xff]   ;;  %v1495_v58 = vld [vmem:[%s1904_s1 + $0x110] sm:$0xff]  }
  0x10   :  { %1256 = vmatpush3.bf16.msra.mxu0 %v1467_v14  ;;  %v1488_v43 = vld [vmem:[%s1904_s1 + $0x180] sm:$0xff]   ;;  %v1492_v47 = vld [vmem:[%s1904_s1 + $0x188] sm:$0xff]   ;;  %v1496_v59 = vld [vmem:[%s1904_s1 + $0x190] sm:$0xff]  }
  0x11   :  { %1296 = vmatpush3.bf16.msra.mxu1 %v1468_v15  ;;  %1257 = vmatprep.subr.bf16.mxu0 %v1469_v16  ;;  %v23_v48 = vld [vmem:[%s1905_s0 + $0x40] sm:$0xff]  ;;  %v24_v51 = vld [vmem:[%s1905_s0 + $0x48] sm:$0xff]  ;;  %v1497_v60 = vld [vmem:[%s1904_s1 + $0x158] sm:$0xff]  }
  0x12   :  { %1297 = vmatprep.subr.bf16.mxu1 %v1470_v17  ;;  %v27_v49 = vld [vmem:[%s1905_s0 + $0x60] sm:$0xff]  ;;  %v28_v52 = vld [vmem:[%s1905_s0 + $0x68] sm:$0xff]  ;;  %v1498_v61 = vld [vmem:[%s1904_s1 + $0x1d8] sm:$0xff]  }
  0x13   :  { %v1153_v50 = vcombine.high %v23_v48, %v27_v49  ;;  %v1152_v53 = vcombine.low %v23_v48, %v27_v49  ;;  %v1155_v54 = vcombine.high %v24_v51, %v28_v52  ;;  %v1154_v55 = vcombine.low %v24_v51, %v28_v52  ;;  %v1499_v62 = vld [vmem:[%s1904_s1 + $0x118] sm:$0xff]   ;;  %v31_v0 = vld [vmem:[%s1905_s0 + $0x80] sm:$0xff]  ;;  %v32_v2 = vld [vmem:[%s1905_s0 + $0x88] sm:$0xff] }
  0x14   :  { %1258 = vmatpush3.bf16.msra.mxu0 %v1471_v18  ;;  %v1500_v63 = vld [vmem:[%s1904_s1 + $0x198] sm:$0xff]   ;;  %v35_v1 = vld [vmem:[%s1905_s0 + $0xa0] sm:$0xff]  ;;  %v36_v3 = vld [vmem:[%s1905_s0 + $0xa8] sm:$0xff] }
  0x15   :  { %1298 = vmatpush3.bf16.msra.mxu1 %v1472_v19  ;;  %1259 = vmatprep.subr.bf16.mxu0 %v1473_v20  ;;  %v1161_v4 = vcombine.high %v31_v0, %v35_v1  ;;  %v1163_v5 = vcombine.high %v32_v2, %v36_v3  ;;  %v1160_v6 = vcombine.low %v31_v0, %v35_v1  ;;  %v1501_v8 = vld [vmem:[%s1904_s1 + $0x160] sm:$0xff]   ;;  %v1505_v12 = vld [vmem:[%s1904_s1 + $0x168] sm:$0xff]   ;;  %v17_v32 = vld [vmem:[%s1905_s0 + $0x10] sm:$0xff] }
  0x16   :  { %1299 = vmatprep.subr.bf16.mxu1 %v1474_v21  ;;  %v1162_v7 = vcombine.low %v32_v2, %v36_v3  ;;  %v1502_v9 = vld [vmem:[%s1904_s1 + $0x1e0] sm:$0xff]   ;;  %v1506_v13 = vld [vmem:[%s1904_s1 + $0x1e8] sm:$0xff]   ;;  %v21_v33 = vld [vmem:[%s1905_s0 + $0x30] sm:$0xff] }
  0x17   :  { %v1503_v10 = vld [vmem:[%s1904_s1 + $0x120] sm:$0xff]   ;;  %v1507_v14 = vld [vmem:[%s1904_s1 + $0x128] sm:$0xff]   ;;  %v1148_v34 = vcombine.low %v17_v32, %v21_v33  ;;  %v18_v36 = vld [vmem:[%s1905_s0 + $0x18] sm:$0xff] }
  0x18   :  { %1260 = vmatpush3.bf16.msra.mxu0 %v1475_v22  ;;  %v1504_v11 = vld [vmem:[%s1904_s1 + $0x1a0] sm:$0xff]   ;;  %v1508_v15 = vld [vmem:[%s1904_s1 + $0x1a8] sm:$0xff]   ;;  %v22_v37 = vld [vmem:[%s1905_s0 + $0x38] sm:$0xff] }
  0x19   :  { %1300 = vmatpush3.bf16.msra.mxu1 %v1476_v23  ;;  %1261 = vmatprep.subr.bf16.mxu0 %v1477_v24  ;;  %v39_v16 = vld [vmem:[%s1905_s0 + $0xc0] sm:$0xff]  ;;  %v40_v18 = vld [vmem:[%s1905_s0 + $0xc8] sm:$0xff]  ;;  %v1509_v24 = vld [vmem:[%s1904_s1 + $0x170] sm:$0xff]   ;;  %v1150_v39 = vcombine.low %v18_v36, %v22_v37 }
  0x1a   :  { %1301 = vmatprep.subr.bf16.mxu1 %v1478_v25  ;;  %v43_v17 = vld [vmem:[%s1905_s0 + $0xe0] sm:$0xff]  ;;  %v44_v20 = vld [vmem:[%s1905_s0 + $0xe8] sm:$0xff]  ;;  %v1510_v25 = vld [vmem:[%s1904_s1 + $0x1f0] sm:$0xff]  }
  0x1b   :  { %v1169_v19 = vcombine.high %v39_v16, %v43_v17  ;;  %v1168_v21 = vcombine.low %v39_v16, %v43_v17  ;;  %v1171_v22 = vcombine.high %v40_v18, %v44_v20  ;;  %v1170_v23 = vcombine.low %v40_v18, %v44_v20  ;;  %v34_v48 = vld [vmem:[%s1905_s0 + $0x98] sm:$0xff]  ;;  %v992_v0 = vld [vmem:[%s1906_s2] sm:$0xff]  ;;  %v993_v1 = vld [vmem:[%s1906_s2 + $0x8] sm:$0xff] }
  0x1c   :  { %1262 = vmatpush3.bf16.msra.mxu0 %v1479_v26  ;;  %v1511_v26 = vld [vmem:[%s1904_s1 + $0x130] sm:$0xff]   ;;  %v38_v49 = vld [vmem:[%s1905_s0 + $0xb8] sm:$0xff]  ;;  %v1441_v2 = vpack.c.bf16 %v993_v1, %v992_v0 }
  0x1d   :  { %1302 = vmatpush3.bf16.msra.mxu1 %v1480_v27  ;;  %1263 = vmatprep.subr.bf16.mxu0 %v1481_v28  ;;  %v1512_v27 = vld [vmem:[%s1904_s1 + $0x1b0] sm:$0xff]   ;;  %v1513_v28 = vld [vmem:[%s1904_s1 + $0x178] sm:$0xff]  }
  0x1e   :  { %1303 = vmatprep.subr.bf16.mxu1 %v1482_v29  ;;  %v1514_v29 = vld [vmem:[%s1904_s1 + $0x1f8] sm:$0xff]   ;;  %v994_v3 = vld [vmem:[%s1906_s2 + $0x10] sm:$0xff] }
  0x20   :  { %1264 = vmatpush3.bf16.msra.mxu0 %v1483_v30  ;;  %v1515_v30 = vld [vmem:[%s1904_s1 + $0x138] sm:$0xff]  }
  0x21   :  { %1304 = vmatpush3.bf16.msra.mxu1 %v1484_v31  ;;  %1329 = vmatprep.subr.bf16.mxu0 %v1485_v40  ;;  %v1516_v31 = vld [vmem:[%s1904_s1 + $0x1b8] sm:$0xff]   ;;  %v1151_v40 = vcombine.high %v18_v36, %v22_v37 }
  0x22   :  { %1369 = vmatprep.subr.bf16.mxu1 %v1486_v41  ;;  %v29_v41 = vld [vmem:[%s1905_s0 + $0x70] sm:$0xff] }
  0x23   :  { %757 = vmatmul.mubr.bf16.vlgmr.msra.gmra.mrb[0].mxu0 %v1144_v35  ;;  %v1149_v35 = vcombine.high %v17_v32, %v21_v33 }
  0x24   :  { %822 = vmatmul.mubr.bf16.vlgmr.msra.gmra.mrb[0].mxu1 %v1146_v38  ;;  %1330 = vmatpush3.bf16.msra.mxu0 %v1487_v42  ;;  %v25_v38 = vld [vmem:[%s1905_s0 + $0x50] sm:$0xff]  ;;  %v26_v42 = vld [vmem:[%s1905_s0 + $0x58] sm:$0xff] }
  0x25   :  { %1370 = vmatpush3.bf16.msra.mxu1 %v1488_v43  ;;  %1331 = vmatprep.subr.bf16.mxu0 %v1489_v44  ;;  %v30_v43 = vld [vmem:[%s1905_s0 + $0x78] sm:$0xff]  ;;  %v1157_v44 = vcombine.high %v25_v38, %v29_v41 }
  0x26   :  { %1371 = vmatprep.subr.bf16.mxu1 %v1490_v45  ;;  %764 = vmatprep.mubr.bf16.mxu0 %v1153_v50  ;;  %v1159_v45 = vcombine.high %v26_v42, %v30_v43  ;;  %v1156_v50 = vcombine.low %v25_v38, %v29_v41  ;;  %v1158_v51 = vcombine.low %v26_v42, %v30_v43 }
  0x27   :  { %829 = vmatprep.mubr.bf16.mxu1 %v1155_v54  ;;  %v41_v54 = vld [vmem:[%s1905_s0 + $0xd0] sm:$0xff] }
  0x28   :  { %1332 = vmatpush3.bf16.msra.mxu0 %v1491_v46  ;;  %v33_v46 = vld [vmem:[%s1905_s0 + $0x90] sm:$0xff] }
  0x29   :  { %1372 = vmatpush3.bf16.msra.mxu1 %v1492_v47  ;;  %1333 = vmatprep.subr.bf16.mxu0 %v1493_v56  ;;  %v37_v47 = vld [vmem:[%s1905_s0 + $0xb0] sm:$0xff]  ;;  %v42_v56 = vld [vmem:[%s1905_s0 + $0xd8] sm:$0xff] }
  0x2a   :  { %1373 = vmatprep.subr.bf16.mxu1 %v1494_v57  ;;  %v1165_v52 = vcombine.high %v33_v46, %v37_v47  ;;  %v46_v57 = vld [vmem:[%s1905_s0 + $0xf8] sm:$0xff] }
  0x2b   :  { %765 = vmatmul.mubr.bf16.gmra.mrb[4].mxu0 %v1152_v53  ;;  %v1167_v53 = vcombine.high %v34_v48, %v38_v49 }
  0x2c   :  { %830 = vmatmul.mubr.bf16.gmra.mrb[4].mxu1 %v1154_v55  ;;  %1334 = vmatpush3.bf16.msra.mxu0 %v1495_v58  ;;  %v45_v55 = vld [vmem:[%s1905_s0 + $0xf0] sm:$0xff]  ;;  %v1164_v58 = vcombine.low %v33_v46, %v37_v47 }
  0x2d   :  { %1374 = vmatpush3.bf16.msra.mxu1 %v1496_v59  ;;  %1335 = vmatprep.subr.bf16.mxu0 %v1497_v60  ;;  %v1166_v59 = vcombine.low %v34_v48, %v38_v49  ;;  %v1173_v60 = vcombine.high %v41_v54, %v45_v55 }
  0x2e   :  { %1375 = vmatprep.subr.bf16.mxu1 %v1498_v61  ;;  %772 = vmatprep.mubr.bf16.mxu0 %v1161_v4  ;;  %v1175_v61 = vcombine.high %v42_v56, %v46_v57  ;;  %v995_v4 = vld [vmem:[%s1906_s2 + $0x18] sm:$0xff] }
  0x2f   :  { %837 = vmatprep.mubr.bf16.mxu1 %v1163_v5  ;;  %v1445_v5 = vpack.c.bf16 %v995_v4, %v994_v3 }
  0x30   :  { %1336 = vmatpush3.bf16.msra.mxu0 %v1499_v62  ;;  %v1172_v62 = vcombine.low %v41_v54, %v45_v55 }
  0x31   :  { %1376 = vmatpush3.bf16.msra.mxu1 %v1500_v63  ;;  %1337 = vmatprep.subr.bf16.mxu0 %v1501_v8  ;;  %v1174_v63 = vcombine.low %v42_v56, %v46_v57  ;;  %v1143_v8 = vld [vmem:[%s1906_s2 + $0x20] ss:$0 sm:$0xff] }
  0x32   :  { %1377 = vmatprep.subr.bf16.mxu1 %v1502_v9 }
  0x33   :  { %773 = vmatmul.mubr.bf16.gmra.mrb[8].mxu0 %v1160_v6 }
  0x34   :  { %838 = vmatmul.mubr.bf16.gmra.mrb[8].mxu1 %v1162_v7  ;;  %1338 = vmatpush3.bf16.msra.mxu0 %v1503_v10 }
  0x35   :  { %1378 = vmatpush3.bf16.msra.mxu1 %v1504_v11  ;;  %1339 = vmatprep.subr.bf16.mxu0 %v1505_v12 }
  0x36   :  { %1379 = vmatprep.subr.bf16.mxu1 %v1506_v13  ;;  %780 = vmatprep.mubr.bf16.mxu0 %v1169_v19 }
  0x37   :  { %845 = vmatprep.mubr.bf16.mxu1 %v1171_v22 }
  0x38   :  { %1340 = vmatpush3.bf16.msra.mxu0 %v1507_v14 }
  0x39   :  { %1380 = vmatpush3.bf16.msra.mxu1 %v1508_v15  ;;  %1341 = vmatprep.subr.bf16.mxu0 %v1509_v24 }
  0x3a   :  { %1381 = vmatprep.subr.bf16.mxu1 %v1510_v25 }
  0x3b   :  { %781 = vmatmul.mubr.bf16.gmra.mrb[12].mxu0 %v1168_v21 }
  0x3c   :  { %846 = vmatmul.mubr.bf16.gmra.mrb[12].mxu1 %v1170_v23  ;;  %1342 = vmatpush3.bf16.msra.mxu0 %v1511_v26 }
  0x3d   :  { %1382 = vmatpush3.bf16.msra.mxu1 %v1512_v27  ;;  %1343 = vmatprep.subr.bf16.mxu0 %v1513_v28 }
  0x3e   :  { %1383 = vmatprep.subr.bf16.mxu1 %v1514_v29  ;;  %886 = vmatprep.mubr.bf16.mxu0 %v1149_v35 }
  0x3f   :  { %951 = vmatprep.mubr.bf16.mxu1 %v1151_v40 }
  0x40   :  { %1344 = vmatpush3.bf16.msra.mxu0 %v1515_v30 }
  0x41   :  { %1384 = vmatpush3.bf16.msra.mxu1 %v1516_v31  ;;  %1442 = vmatprep.subr.bf16.mxu0 %v1441_v2 }
  0x42   :  { %1449 = vmatprep.subr.bf16.mxu1 %v1441_v2 }
  0x43   :  { %887 = vmatmul.mubr.bf16.vlgmr.msra.gmra.mrb[16].mxu0 %v1148_v34 }
  0x44   :  { %952 = vmatmul.mubr.bf16.vlgmr.msra.gmra.mrb[16].mxu1 %v1150_v39  ;;  %894 = vmatprep.mubr.bf16.mxu0 %v1157_v44 }
  0x45   :  { %959 = vmatprep.mubr.bf16.mxu1 %v1159_v45  ;;  %1444 = vmatpush3.bf16.msra.mxu0 %v1441_v2 }
  0x46   :  { %1451 = vmatpush3.bf16.msra.mxu1 %v1441_v2  ;;  %1446 = vmatprep.subr.bf16.mxu0 %v1445_v5 }
  0x47   :  { %1450 = vmatprep.subr.bf16.mxu1 %v1445_v5 }
  0x49   :  { %1448 = vmatpush3.bf16.msra.mxu0 %v1445_v5 }
  0x4a   :  { %1452 = vmatpush3.bf16.msra.mxu1 %v1445_v5 }
  0x4b   :  { %895 = vmatmul.mubr.bf16.gmra.mrb[20].mxu0 %v1156_v50 }
  0x4c   :  { %960 = vmatmul.mubr.bf16.gmra.mrb[20].mxu1 %v1158_v51  ;;  %902 = vmatprep.mubr.bf16.mxu0 %v1165_v52 }
  0x4d   :  { %967 = vmatprep.mubr.bf16.mxu1 %v1167_v53 }
  0x53   :  { %903 = vmatmul.mubr.bf16.gmra.mrb[24].mxu0 %v1164_v58 }
  0x54   :  { %968 = vmatmul.mubr.bf16.gmra.mrb[24].mxu1 %v1166_v59  ;;  %910 = vmatprep.mubr.bf16.mxu0 %v1173_v60 }
  0x55   :  { %975 = vmatprep.mubr.bf16.mxu1 %v1175_v61 }
  0x5b   :  { %911 = vmatmul.mubr.bf16.gmra.mrb[28].mxu0 %v1172_v62 }
  0x5c   :  { %976 = vmatmul.mubr.bf16.gmra.mrb[28].mxu1 %v1174_v63 }
  0xf6   :  { %v1265_v6 = vpop.f32.mrb[0].mxu0 }
  0xf7   :  { %v1305_v7 = vpop.f32.mrb[0].mxu1  ;;  %v1266_v9 = vpop.f32.mrb[1].mxu0 }
  0xf8   :  { %v1267_v10 = vadd.f32 %v1266_v9, %v1265_v6  ;;  %v1306_v11 = vpop.f32.mrb[1].mxu1  ;;  %v1268_v12 = vpop.f32.mrb[2].mxu0 }
  0xf9   :  { %v1307_v13 = vadd.f32 %v1306_v11, %v1305_v7  ;;  %v1308_v14 = vpop.f32.mrb[2].mxu1  ;;  %v1269_v15 = vpop.f32.mrb[3].mxu0 }
  0xfa   :  { %v759_v16 = vadd.f32 %v1267_v10, %v1143_v8  ;;  %v1270_v17 = vadd.f32 %v1269_v15, %v1268_v12  ;;  %v1309_v18 = vpop.f32.mrb[3].mxu1 }
  0xfb   :  { %v1310_v19 = vadd.f32 %v1309_v18, %v1308_v14 }
  0xfc   :  { %v824_v20 = vadd.f32 %v1307_v13, %v759_v16  ;;  %v762_v21 = vadd.f32 %v1270_v17, %v1143_v8 }
  0xfe   :  { %v1840_v22 = vadd.f32 %v1310_v19, %v762_v21  ;;  %v1271_v23 = vpop.f32.mrb[4].mxu0 }
  0xff   :  { %v1311_v24 = vpop.f32.mrb[4].mxu1  ;;  %v1272_v25 = vpop.f32.mrb[5].mxu0 }
 0x100   :  { %v1273_v26 = vadd.f32 %v1272_v25, %v1271_v23  ;;  %v1312_v27 = vpop.f32.mrb[5].mxu1  ;;  %v1274_v28 = vpop.f32.mrb[6].mxu0 }
 0x101   :  { %v1313_v29 = vadd.f32 %v1312_v27, %v1311_v24  ;;  %v1314_v30 = vpop.f32.mrb[6].mxu1  ;;  %v1275_v31 = vpop.f32.mrb[7].mxu0 }
 0x102   :  { %v767_v32 = vadd.f32 %v1273_v26, %v1143_v8  ;;  %v1276_v33 = vadd.f32 %v1275_v31, %v1274_v28  ;;  %v1315_v34 = vpop.f32.mrb[7].mxu1 }
 0x103   :  { %v1316_v35 = vadd.f32 %v1315_v34, %v1314_v30 }
 0x104   :  { %v1842_v36 = vadd.f32 %v1313_v29, %v767_v32  ;;  %v770_v37 = vadd.f32 %v1276_v33, %v1143_v8 }
 0x106   :  { %v1844_v38 = vadd.f32 %v1316_v35, %v770_v37  ;;  %v1277_v39 = vpop.f32.mrb[8].mxu0 }
 0x107   :  { %v1317_v40 = vpop.f32.mrb[8].mxu1  ;;  %v1278_v41 = vpop.f32.mrb[9].mxu0 }
 0x108   :  { %v1318_v42 = vpop.f32.mrb[9].mxu1  ;;  %v1279_v43 = vadd.f32 %v1278_v41, %v1277_v39  ;;  %v1280_v45 = vpop.f32.mrb[10].mxu0 }
 0x109   :  { %v1319_v44 = vadd.f32 %v1318_v42, %v1317_v40  ;;  %v1320_v46 = vpop.f32.mrb[10].mxu1  ;;  %v1281_v47 = vpop.f32.mrb[11].mxu0 }
 0x10a   :  { %v1321_v48 = vpop.f32.mrb[11].mxu1  ;;  %v775_v49 = vadd.f32 %v1279_v43, %v1143_v8  ;;  %v1282_v50 = vadd.f32 %v1281_v47, %v1280_v45 }
 0x10b   :  { %v1322_v51 = vadd.f32 %v1321_v48, %v1320_v46 }
 0x10c   :  { %v1846_v52 = vadd.f32 %v1319_v44, %v775_v49  ;;  %v778_v53 = vadd.f32 %v1282_v50, %v1143_v8 }
 0x10e   :  { %v1848_v54 = vadd.f32 %v1322_v51, %v778_v53  ;;  %v1283_v55 = vpop.f32.mrb[12].mxu0 }
 0x10f   :  { %v1323_v56 = vpop.f32.mrb[12].mxu1  ;;  %v1284_v57 = vpop.f32.mrb[13].mxu0 }
 0x110   :  { %v1285_v58 = vadd.f32 %v1284_v57, %v1283_v55  ;;  %v1324_v59 = vpop.f32.mrb[13].mxu1  ;;  %v1286_v60 = vpop.f32.mrb[14].mxu0 }
 0x111   :  { %v1325_v61 = vadd.f32 %v1324_v59, %v1323_v56  ;;  %v1326_v62 = vpop.f32.mrb[14].mxu1  ;;  %v1287_v63 = vpop.f32.mrb[15].mxu0 }
 0x112   :  { %v783_v0 = vadd.f32 %v1285_v58, %v1143_v8  ;;  %v1288_v1 = vadd.f32 %v1287_v63, %v1286_v60  ;;  %v1327_v2 = vpop.f32.mrb[15].mxu1 }
 0x113   :  { %v1328_v3 = vadd.f32 %v1327_v2, %v1326_v62 }
 0x114   :  { %v1850_v4 = vadd.f32 %v1325_v61, %v783_v0  ;;  %v786_v5 = vadd.f32 %v1288_v1, %v1143_v8 }
 0x116   :  { %v1852_v6 = vadd.f32 %v1328_v3, %v786_v5  ;;  %v1345_v7 = vpop.f32.mrb[16].mxu0 }
 0x117   :  { %v1385_v9 = vpop.f32.mrb[16].mxu1  ;;  %v1346_v10 = vpop.f32.mrb[17].mxu0 }
 0x118   :  { %v1347_v11 = vadd.f32 %v1346_v10, %v1345_v7  ;;  %v1386_v12 = vpop.f32.mrb[17].mxu1  ;;  %v1348_v13 = vpop.f32.mrb[18].mxu0 }
 0x119   :  { %v1387_v14 = vadd.f32 %v1386_v12, %v1385_v9  ;;  %v1388_v15 = vpop.f32.mrb[18].mxu1  ;;  %v1349_v16 = vpop.f32.mrb[19].mxu0 }
 0x11a   :  { %v889_v17 = vadd.f32 %v1347_v11, %v824_v20  ;;  %v1350_v18 = vadd.f32 %v1349_v16, %v1348_v13  ;;  %v1389_v19 = vpop.f32.mrb[19].mxu1 }
 0x11b   :  { %v1390_v21 = vadd.f32 %v1389_v19, %v1388_v15 }
 0x11c   :  { %v954_v23 = vadd.f32 %v1387_v14, %v889_v17  ;;  %v892_v24 = vadd.f32 %v1350_v18, %v1840_v22  ;;  %v1240_v18 = vld [vmem:[%s1906_s2 + $0x21] ss:$0 sm:$0xff] }
 0x11e   :  { %v984_v8 = vmax.f32 %v954_v23, 0.0  ;;  %v957_v25 = vadd.f32 %v1390_v21, %v892_v24  ;;  %v1351_v26 = vpop.f32.mrb[20].mxu0 }
 0x11f   :  { %v1391_v27 = vpop.f32.mrb[20].mxu1  ;;  %v1352_v28 = vpop.f32.mrb[21].mxu0 }
 0x120   :  { %v985_v29 = vmax.f32 %v957_v25, 0.0  ;;  %v1353_v30 = vadd.f32 %v1352_v28, %v1351_v26  ;;  %v1392_v31 = vpop.f32.mrb[21].mxu1  ;;  %v1354_v32 = vpop.f32.mrb[22].mxu0  ;;  %1429 = vmatprep.mubr.msk.f32.mxu0 %vm1001_vm0, %v984_v8 }
 0x121   :  { %v1393_v33 = vadd.f32 %v1392_v31, %v1391_v27  ;;  %v1394_v20 = vpop.f32.mrb[22].mxu1  ;;  %v1355_v34 = vpop.f32.mrb[23].mxu0 }
 0x122   :  { %v897_v35 = vadd.f32 %v1353_v30, %v1842_v36  ;;  %v1356_v37 = vadd.f32 %v1355_v34, %v1354_v32  ;;  %v1395_v39 = vpop.f32.mrb[23].mxu1  ;;  %1430 = vmatmul.mubr.msk.f32.vlgmr.msra.gmra.mrb[32].mxu0 %vm1001_vm0, %v985_v29 }
 0x123   :  { %v1396_v22 = vadd.f32 %v1395_v39, %v1394_v20 }
 0x124   :  { %v962_v40 = vadd.f32 %v1393_v33, %v897_v35  ;;  %v900_v41 = vadd.f32 %v1356_v37, %v1844_v38 }
 0x126   :  { %v986_v42 = vmax.f32 %v962_v40, 0.0  ;;  %v965_v43 = vadd.f32 %v1396_v22, %v900_v41  ;;  %v1357_v44 = vpop.f32.mrb[24].mxu0 }
 0x127   :  { %v1397_v45 = vpop.f32.mrb[24].mxu1  ;;  %v1358_v46 = vpop.f32.mrb[25].mxu0 }
 0x128   :  { %v987_v47 = vmax.f32 %v965_v43, 0.0  ;;  %v1359_v48 = vadd.f32 %v1358_v46, %v1357_v44  ;;  %v1398_v49 = vpop.f32.mrb[25].mxu1  ;;  %v1360_v50 = vpop.f32.mrb[26].mxu0  ;;  %1432 = vmatprep.mubr.msk.f32.mxu0 %vm1001_vm0, %v986_v42 }
 0x129   :  { %v1399_v36 = vadd.f32 %v1398_v49, %v1397_v45  ;;  %v1400_v51 = vpop.f32.mrb[26].mxu1  ;;  %v1361_v53 = vpop.f32.mrb[27].mxu0 }
 0x12a   :  { %v905_v55 = vadd.f32 %v1359_v48, %v1846_v52  ;;  %v1362_v56 = vadd.f32 %v1361_v53, %v1360_v50  ;;  %v1401_v57 = vpop.f32.mrb[27].mxu1  ;;  %1433 = vmatmul.mubr.msk.f32.gmra.mrb[34].mxu0 %vm1001_vm0, %v987_v47 }
 0x12b   :  { %v1402_v38 = vadd.f32 %v1401_v57, %v1400_v51 }
 0x12c   :  { %v970_v58 = vadd.f32 %v1399_v36, %v905_v55  ;;  %v908_v59 = vadd.f32 %v1362_v56, %v1848_v54 }
 0x12e   :  { %v988_v60 = vmax.f32 %v970_v58, 0.0  ;;  %v973_v61 = vadd.f32 %v1402_v38, %v908_v59  ;;  %v1363_v62 = vpop.f32.mrb[28].mxu0 }
 0x12f   :  { %v1403_v63 = vpop.f32.mrb[28].mxu1  ;;  %v1364_v0 = vpop.f32.mrb[29].mxu0 }
 0x130   :  { %v989_v1 = vmax.f32 %v973_v61, 0.0  ;;  %v1365_v2 = vadd.f32 %v1364_v0, %v1363_v62  ;;  %v1404_v3 = vpop.f32.mrb[29].mxu1  ;;  %v1366_v5 = vpop.f32.mrb[30].mxu0  ;;  %1435 = vmatprep.mubr.msk.f32.mxu1 %vm1001_vm0, %v988_v60 }
 0x131   :  { %v1405_v52 = vadd.f32 %v1404_v3, %v1403_v63  ;;  %v1406_v7 = vpop.f32.mrb[30].mxu1  ;;  %v1367_v9 = vpop.f32.mrb[31].mxu0 }
 0x132   :  { %v913_v10 = vadd.f32 %v1365_v2, %v1850_v4  ;;  %v1368_v11 = vadd.f32 %v1367_v9, %v1366_v5  ;;  %v1407_v12 = vpop.f32.mrb[31].mxu1  ;;  %1436 = vmatmul.mubr.msk.f32.vlgmr.msra.gmra.mrb[32].mxu1 %vm1001_vm0, %v989_v1 }
 0x133   :  { %v1408_v54 = vadd.f32 %v1407_v12, %v1406_v7 }
 0x134   :  { %v978_v13 = vadd.f32 %v1405_v52, %v913_v10  ;;  %v916_v14 = vadd.f32 %v1368_v11, %v1852_v6 }
 0x136   :  { %v990_v15 = vmax.f32 %v978_v13, 0.0  ;;  %v981_v16 = vadd.f32 %v1408_v54, %v916_v14 }
 0x138   :  { %v991_v17 = vmax.f32 %v981_v16, 0.0  ;;  %1438 = vmatprep.mubr.msk.f32.mxu1 %vm1001_vm0, %v990_v15 }
 0x13a   :  { %1439 = vmatmul.mubr.msk.f32.gmra.mrb[34].mxu1 %vm1001_vm0, %v991_v17 }
 0x1f5   :  { %v1431_v4 = vpop.f32.mrb[32].mxu0 }
 0x1f6   :  { %v1098_v19 = vadd.f32 %v1431_v4, %v1240_v18  ;;  %v1092_v21 = vpop.f32.mrb[33].mxu0 }
 0x1f7   :  { %v1093_v23 = vadd.f32 %v1240_v18, %v1092_v21 }
 0x1f8   :  { %1132 = vst.msk [vmem:[%s1907_s3 + $0x8] sm:$0xff] %vm1001_vm0, %v1098_v19 }
 0x1f9   :  { %1131 = vst.msk [vmem:[%s1907_s3] sm:$0xff] %vm1001_vm0, %v1093_v23 }
 0x1fd   :  { %v1434_v6 = vpop.f32.mrb[34].mxu0 }
 0x1fe   :  { %v1108_v24 = vadd.f32 %v1434_v6, %v1240_v18  ;;  %v1102_v8 = vpop.f32.mrb[35].mxu0 }
 0x1ff   :  { %v1103_v25 = vadd.f32 %v1240_v18, %v1102_v8 }
 0x200   :  { %1134 = vst.msk [vmem:[%s1907_s3 + $0x18] sm:$0xff] %vm1001_vm0, %v1108_v24 }
 0x201   :  { %1133 = vst.msk [vmem:[%s1907_s3 + $0x10] sm:$0xff] %vm1001_vm0, %v1103_v25 }
 0x205   :  { %v1437_v26 = vpop.f32.mrb[32].mxu1 }
 0x206   :  { %v1118_v27 = vadd.f32 %v1437_v26, %v1240_v18  ;;  %v1112_v28 = vpop.f32.mrb[33].mxu1 }
 0x207   :  { %v1113_v29 = vadd.f32 %v1240_v18, %v1112_v28 }
 0x208   :  { %1136 = vst.msk [vmem:[%s1907_s3 + $0x28] sm:$0xff] %vm1001_vm0, %v1118_v27 }
 0x209   :  { %1135 = vst.msk [vmem:[%s1907_s3 + $0x20] sm:$0xff] %vm1001_vm0, %v1113_v29 }
 0x20d   :  { %v1440_v30 = vpop.f32.mrb[34].mxu1 }
 0x20e   :  { %v1128_v31 = vadd.f32 %v1440_v30, %v1240_v18  ;;  %v1122_v32 = vpop.f32.mrb[35].mxu1 }
 0x20f   :  { %v1123_v33 = vadd.f32 %v1240_v18, %v1122_v32 }
 0x210   :  { %1138 = vst.msk [vmem:[%s1907_s3 + $0x38] sm:$0xff] %vm1001_vm0, %v1128_v31 }
 0x211   :  { %1137 = vst.msk [vmem:[%s1907_s3 + $0x30] sm:$0xff] %vm1001_vm0, %v1123_v33 }

</bundles_post_ra>
